<compile_context>
chip_gen: v5e
topology: v5e:2x2
jax: 0.10.0
libtpu: 0.0.40
codegen_flags: <defaults>
</compile_context>

<pallas_src>
import functools

import jax
import jax.numpy as jnp
from jax.experimental import pallas as pl
from jax.experimental.pallas import tpu as pltpu

THRESHOLD = 0.2
_LANES = 128
_TM_DEFAULT = 2048                     # 2048 x 128 x 4B = 1 MiB per input block
_NUM_CORE_SLICES = 2                   # leading 'parallel' axis (v7x 2-TC split)
_FUSED_MAX_BYTES = 12 * 1024 * 1024    # gate for the fused single-pass path


# ---------------------------------------------------------------------------
# Kernels
# ---------------------------------------------------------------------------
def _fused_kernel(gt_ref, pred_ref, out_ref, *, threshold):
    """Single-pass BerHu: whole (rows, 128) arrays resident in VMEM."""
    gt = gt_ref[...].astype(jnp.float32)
    pred = pred_ref[...].astype(jnp.float32) * (gt > 0.0).astype(jnp.float32)
    d = jnp.abs(gt - pred)
    delta = threshold * jnp.max(d)
    # part1 = -F.threshold(-d, -delta, 0) = d where d < delta else 0 (strict)
    part1 = jnp.where(d < delta, d, 0.0)
    # part2 = (F.threshold(d^2 - delta^2, 0, -delta^2) + delta^2) / (2*delta)
    #       = d^2 / (2*delta) where d^2 > delta^2 else 0 (strict)
    d2 = d * d
    part2 = jnp.where(d2 > delta * delta, d2, 0.0) * (0.5 / delta)
    out_ref[...] = jnp.sum(part1 + part2, keepdims=True)


def _max_kernel(gt_ref, pred_ref, out_ref, acc_ref, *, tm, rows):
    """Pass 1: per-core-slice max of |gt - pred*mask| over big tiles."""
    c = pl.program_id(0)
    i = pl.program_id(1)
    nsteps = pl.num_programs(1)

    @pl.when(i == 0)
    def _():
        acc_ref[...] = jnp.zeros_like(acc_ref)

    gt = gt_ref[...].astype(jnp.float32)
    pred = pred_ref[...].astype(jnp.float32) * (gt > 0.0).astype(jnp.float32)
    d = jnp.abs(gt - pred)

    # Mask rows past the logical end (partial edge block / clamped OOB blocks).
    row0 = (c * nsteps + i) * tm
    ridx = row0 + jax.lax.broadcasted_iota(jnp.int32, (tm, _LANES), 0)
    d = jnp.where(ridx < rows, d, 0.0)

    acc_ref[...] = jnp.maximum(acc_ref[...], d)   # elementwise; reduce only once

    @pl.when(i == nsteps - 1)
    def _():
        out_ref[...] = jnp.max(acc_ref[...], keepdims=True)  # (1, 1)


def _loss_kernel(scal_ref, gt_ref, pred_ref, out_ref, acc_ref, *, tm, rows):
    """Pass 2: per-core-slice BerHu sum; delta stats come in through SMEM."""
    c = pl.program_id(0)
    i = pl.program_id(1)
    nsteps = pl.num_programs(1)

    @pl.when(i == 0)
    def _():
        acc_ref[...] = jnp.zeros_like(acc_ref)

    delta = scal_ref[0]
    delta_sq = scal_ref[1]
    inv_2delta = scal_ref[2]   # precomputed 1/(2*delta): multiply, don't divide

    gt = gt_ref[...].astype(jnp.float32)
    pred = pred_ref[...].astype(jnp.float32) * (gt > 0.0).astype(jnp.float32)
    d = jnp.abs(gt - pred)

    row0 = (c * nsteps + i) * tm
    ridx = row0 + jax.lax.broadcasted_iota(jnp.int32, (tm, _LANES), 0)
    d = jnp.where(ridx < rows, d, 0.0)

    part1 = jnp.where(d < delta, d, 0.0)
    d2 = d * d
    part2 = jnp.where(d2 > delta_sq, d2, 0.0) * inv_2delta
    acc_ref[...] = acc_ref[...] + part1 + part2

    @pl.when(i == nsteps - 1)
    def _():
        out_ref[...] = jnp.sum(acc_ref[...], keepdims=True)  # (1, 1)


# ---------------------------------------------------------------------------
# Wrapper
# ---------------------------------------------------------------------------
def _to_2d(x):
    """Flatten to (rows, 128). Free reshape when size % 128 == 0; otherwise
    only the ragged lane tail is zero-padded."""
    flat = x.reshape(-1)
    n = flat.shape[0]
    pad = (-n) % _LANES
    if pad:
        # TODO(synk): the rare ragged-lane case still materializes one padded
        # copy; a fully copy-free path would need a manual-DMA tail kernel.
        flat = jnp.pad(flat, (0, pad))
    return flat.reshape(-1, _LANES)


def _berhu_fused(gt2, pred2, threshold):
    rows = gt2.shape[0]
    full = pl.BlockSpec((rows, _LANES), lambda i: (0, 0))
    loss = pl.pallas_call(
        functools.partial(_fused_kernel, threshold=float(threshold)),
        out_shape=jax.ShapeDtypeStruct((1, 1), jnp.float32),
        grid=(1,),
        in_specs=[full, full],
        out_specs=pl.BlockSpec((1, 1), lambda i: (0, 0)),
        compiler_params=pltpu.CompilerParams(dimension_semantics=("arbitrary",)),
    )(gt2, pred2)
    return loss[0, 0]


def _berhu_two_pass(gt2, pred2, threshold, block_rows):
    rows = gt2.shape[0]
    tm = int(block_rows)
    n_blocks = pl.cdiv(rows, tm)
    nc = _NUM_CORE_SLICES if n_blocks > 1 else 1
    steps = pl.cdiv(n_blocks, nc)
    last_block = n_blocks - 1

    def in_map(c, i):
        # Clamp so fully-out-of-range logical blocks reuse the last valid block
        # (their contribution is masked to zero in-kernel).
        return (jnp.minimum(c * steps + i, last_block), 0)

    tile = pl.BlockSpec((tm, _LANES), in_map)
    out_part = pl.BlockSpec((1, 1), lambda c, i: (c, 0))
    params = pltpu.CompilerParams(dimension_semantics=("parallel", "arbitrary"))
    acc = pltpu.VMEM((tm, _LANES), jnp.float32)

    # Pass 1: global max of diff (per core slice, combined outside).
    maxes = pl.pallas_call(
        functools.partial(_max_kernel, tm=tm, rows=rows),
        out_shape=jax.ShapeDtypeStruct((nc, 1), jnp.float32),
        grid=(nc, steps),
        in_specs=[tile, tile],
        out_specs=out_part,
        scratch_shapes=[acc],
        compiler_params=params,
    )(gt2, pred2)

    delta = (threshold * jnp.max(maxes)).astype(jnp.float32)
    scalars = jnp.stack([delta, delta * delta, 0.5 / delta]).astype(jnp.float32)

    # Pass 2: BerHu loss sum with delta stats in SMEM.
    sums = pl.pallas_call(
        functools.partial(_loss_kernel, tm=tm, rows=rows),
        out_shape=jax.ShapeDtypeStruct((nc, 1), jnp.float32),
        grid=(nc, steps),
        in_specs=[
            pl.BlockSpec(memory_space=pltpu.MemorySpace.SMEM),
            tile,
            tile,
        ],
        out_specs=out_part,
        scratch_shapes=[acc],
        compiler_params=params,
    )(scalars, gt2, pred2)

    return jnp.sum(sums)


def berhu_loss(gt, pred, threshold=THRESHOLD, *, block_rows=_TM_DEFAULT,
               fused_max_bytes=_FUSED_MAX_BYTES):
    # TODO(synk): bilinear-upsample branch (pred.shape != gt.shape) not implemented.
    assert gt.shape == pred.shape, "upsample branch not implemented"

    gt2 = _to_2d(gt)
    pred2 = _to_2d(pred)

    total_bytes = (gt2.size * gt2.dtype.itemsize
                   + pred2.size * pred2.dtype.itemsize)
    if total_bytes <= fused_max_bytes:
        return _berhu_fused(gt2, pred2, threshold)
    return _berhu_two_pass(gt2, pred2, threshold, block_rows)


# ---------------------------------------------------------------------------
# Pure-JAX reference (mirrors the PyTorch module)
# ---------------------------------------------------------------------------
def _reference(gt, pred, threshold=THRESHOLD):
    gt = gt.astype(jnp.float32)
    pred = pred.astype(jnp.float32)
    mask = (gt > 0).astype(gt.dtype)
    pred = pred * mask
    diff = jnp.abs(gt - pred)
    delta = threshold * jnp.max(diff)
    part1 = jnp.where(diff < delta, diff, 0.0)
    part2 = jnp.where(diff * diff > delta * delta, diff * diff, 0.0) / (2.0 * delta)
    return jnp.sum(part1 + part2)


if __name__ == "__main__":
    key = jax.random.PRNGKey(0)
    k1, k2, k3, k4 = jax.random.split(key, 4)

    # Small input -> fused single-pass path.
    gt = jax.random.normal(k1, (2, 4, 16, 16), dtype=jnp.float32)
    pred = jax.random.normal(k2, (2, 4, 16, 16), dtype=jnp.float32)
    out = jax.block_until_ready(berhu_loss(gt, pred))
    ref = jax.block_until_ready(_reference(gt, pred))
    assert jnp.allclose(out, ref, rtol=1e-5, atol=1e-5), (out, ref)

    # Larger input forced through the tiled two-pass path with a tiny block to
    # exercise grid accumulation, edge-block tail masking and the 2-slice split.
    gt_b = jax.random.normal(k3, (2, 3, 40, 40), dtype=jnp.float32)
    pred_b = jax.random.normal(k4, (2, 3, 40, 40), dtype=jnp.float32)
    out_b = jax.block_until_ready(
        berhu_loss(gt_b, pred_b, block_rows=16, fused_max_bytes=0))
    ref_b = jax.block_until_ready(_reference(gt_b, pred_b))
    assert jnp.allclose(out_b, ref_b, rtol=1e-4, atol=1e-4), (out_b, ref_b)

    print("KERNEL_OK")
</pallas_src>

<mosaic_0001>
module attributes {stable_mosaic.version = 11 : i64} {
  func.func @_fused_kernel(%arg0: i32, %arg1: memref<16x128xf32, #tpu.memory_space<vmem>>, %arg2: memref<16x128xf32, #tpu.memory_space<vmem>>, %arg3: memref<1x1xf32, #tpu.memory_space<vmem>>) attributes {dimension_semantics = [#tpu.dimension_semantics<arbitrary>], iteration_bounds = array<i64: 1>, scalar_prefetch = 0 : i64, scratch_operands = 0 : i64, tpu.core_type = #tpu.core_type<tc>, window_params = [{pipeline_mode = #tpu.pipeline_mode<synchronous>, transform_indices = @transform_0, window_bounds = array<i64: 16, 128>}, {pipeline_mode = #tpu.pipeline_mode<synchronous>, transform_indices = @transform_1, window_bounds = array<i64: 16, 128>}, {pipeline_mode = #tpu.pipeline_mode<synchronous>, transform_indices = @transform_2, window_bounds = array<i64: 1, 1>}]} {
    %c0 = arith.constant 0 : index
    %c0_0 = arith.constant 0 : index
    %0 = vector.load %arg1[%c0, %c0_0] : memref<16x128xf32, #tpu.memory_space<vmem>>, vector<16x128xf32>
    %c0_1 = arith.constant 0 : index
    %c0_2 = arith.constant 0 : index
    %1 = vector.load %arg2[%c0_1, %c0_2] : memref<16x128xf32, #tpu.memory_space<vmem>>, vector<16x128xf32>
    %cst = arith.constant 0.000000e+00 : f32
    %2 = vector.broadcast %cst : f32 to vector<16x128xf32>
    %3 = arith.cmpf ogt, %0, %2 : vector<16x128xf32>
    %4 = arith.extui %3 : vector<16x128xi1> to vector<16x128xi32>
    %5 = arith.sitofp %4 : vector<16x128xi32> to vector<16x128xf32>
    %6 = arith.mulf %1, %5 : vector<16x128xf32>
    %7 = arith.subf %0, %6 : vector<16x128xf32>
    %8 = math.absf %7 : vector<16x128xf32>
    %9 = vector.shape_cast %8 : vector<16x128xf32> to vector<1x16x128xf32>
    %cst_3 = arith.constant dense<0xFF800000> : vector<1xf32>
    %10 = vector.multi_reduction <maximumf>, %9, %cst_3 [1, 2] : vector<1x16x128xf32> to vector<1xf32>
    %11 = vector.shape_cast %10 : vector<1xf32> to vector<1x1x1xf32>
    %12 = vector.extract %11[0, 0, 0] : f32 from vector<1x1x1xf32>
    %cst_4 = arith.constant 2.000000e-01 : f32
    %13 = arith.mulf %cst_4, %12 : f32
    %14 = vector.broadcast %13 : f32 to vector<16x128xf32>
    %15 = arith.cmpf olt, %8, %14 : vector<16x128xf32>
    %cst_5 = arith.constant 0.000000e+00 : f32
    %16 = vector.broadcast %cst_5 : f32 to vector<16x128xf32>
    %17 = arith.select %15, %8, %16 : vector<16x128xi1>, vector<16x128xf32>
    %18 = arith.mulf %8, %8 : vector<16x128xf32>
    %19 = arith.mulf %13, %13 : f32
    %20 = vector.broadcast %19 : f32 to vector<16x128xf32>
    %21 = arith.cmpf ogt, %18, %20 : vector<16x128xf32>
    %cst_6 = arith.constant 0.000000e+00 : f32
    %22 = vector.broadcast %cst_6 : f32 to vector<16x128xf32>
    %23 = arith.select %21, %18, %22 : vector<16x128xi1>, vector<16x128xf32>
    %cst_7 = arith.constant 5.000000e-01 : f32
    %24 = arith.divf %cst_7, %13 : f32
    %25 = vector.broadcast %24 : f32 to vector<16x128xf32>
    %26 = arith.mulf %23, %25 : vector<16x128xf32>
    %27 = arith.addf %17, %26 : vector<16x128xf32>
    %28 = vector.shape_cast %27 : vector<16x128xf32> to vector<1x16x128xf32>
    %cst_8 = arith.constant dense<0.000000e+00> : vector<1xf32>
    %29 = vector.multi_reduction <add>, %28, %cst_8 [1, 2] : vector<1x16x128xf32> to vector<1xf32>
    %30 = vector.shape_cast %29 : vector<1xf32> to vector<1x1x1xf32>
    %31 = vector.extract %30[0, 0, 0] : f32 from vector<1x1x1xf32>
    %32 = vector.broadcast %31 : f32 to vector<1x1xf32>
    %c0_9 = arith.constant 0 : index
    %c0_10 = arith.constant 0 : index
    %33 = vector.load %arg3[%c0_9, %c0_10] : memref<1x1xf32, #tpu.memory_space<vmem>>, vector<1x1xf32>
    tpu.vector_store %arg3[%c0_9, %c0_10], %32 {strides = array<i32>} : memref<1x1xf32, #tpu.memory_space<vmem>>, vector<1x1xf32>,
    return
  }
  func.func @transform_0(%arg0: i32) -> (i32, i32) {
    %c0_i32 = arith.constant 0 : i32
    %c0_i32_0 = arith.constant 0 : i32
    %c0_i32_1 = arith.constant 0 : i32
    return %c0_i32, %c0_i32_0 : i32, i32
  }
  func.func @transform_1(%arg0: i32) -> (i32, i32) {
    %c0_i32 = arith.constant 0 : i32
    %c0_i32_0 = arith.constant 0 : i32
    %c0_i32_1 = arith.constant 0 : i32
    return %c0_i32, %c0_i32_0 : i32, i32
  }
  func.func @transform_2(%arg0: i32) -> (i32, i32) {
    %c0_i32 = arith.constant 0 : i32
    %c0_i32_0 = arith.constant 0 : i32
    %c0_i32_1 = arith.constant 0 : i32
    return %c0_i32, %c0_i32_0 : i32, i32
  }
}

</mosaic_0001>

<bundles_post_ra>
// kernel: tpu_custom_call.1
= control target key start
LH: loop header
LB: loop body
LE: loop exit
PB: predicated region body
PF: predicated region fallthrough
CT: control target
= control target key end

     0   :  { %7 = vsyncpa [#allocation3], 0  ;;  %s261_s0 = inlined_call_operand.hbm [shape: f32[16,128], index: 0, kind: input, shape index: {}]   ;;  %s262_s1 = inlined_call_operand.hbm [shape: f32[16,128], index: 1, kind: input, shape index: {}]   ;;  %s263_s2 = inlined_call_operand.hbm [shape: f32[1,1], index: 2, kind: output, shape index: {}]  }
   0x1   :  { %8 = vsyncpa [#allocation6], 0 }
   0x2   :  { %9 = vsyncpa [#allocation4], 0  ;;  %s14_s11 = sshll.u32 %s261_s0, 4  ;;  %s231_s12 = smov [#allocation2]   ;;  %s15_s11 = int_to_ptr.hbm [resolvable:$true] %s14_s11 }
   0x3   :  { %s16_s13 = sshll.u32 %s231_s12, 4  ;;  %s27_s16 = sshll.u32 %s262_s1, 4  ;;  %s17_s13 = int_to_ptr.vmem [resolvable:$true] %s16_s13  ;;  %s28_s16 = int_to_ptr.hbm [resolvable:$true] %s27_s16 }
   0x4   :  { %s232_s17 = smov 128   ;;  %s233_s18 = smov 8  }
   0x5   :  { %22 = dma.hbm_to_vmem [thread:$0]  %s15_s11, 256, %s17_s13, [#allocation3], %s232_s17, %s232_s17, %s233_s18  }
   0x6   :  { %s234_s19 = smov [#allocation5]  }
   0x7   :  { %s29_s20 = sshll.u32 %s234_s19, 4  ;;  %s30_s20 = int_to_ptr.vmem [resolvable:$true] %s29_s20 }
   0x8   :  { %35 = dma.hbm_to_vmem [thread:$0]  %s28_s16, 256, %s30_s20, [#allocation6], %s232_s17, %s232_s17, %s233_s18  }
   0x9   :  { %225 = dma.done.wait [#allocation3], 256  }
   0xa   :  { %226 = vsyncadd [#allocation3], 4294967040 }
   0xb   :  { %227 = dma.done.wait [#allocation6], 256  }
   0xc   :  { %228 = vsyncadd [#allocation6], 4294967040  ;;  %v44_v0 = vld [vmem:[#allocation2] sm:$0xff]  ;;  %v45_v1 = vld [vmem:[#allocation2 + $0x8] sm:$0xff]  ;;  %v235_v4 = vmov 0.0   ;;  %s126_s26 = sshll.u32 %s263_s2, 4  ;;  %s127_s26 = int_to_ptr.hbm [resolvable:$true] %s126_s26 }
   0xd   :  { %v46_v2 = vld [vmem:[#allocation5] sm:$0xff]  ;;  %v47_v3 = vld [vmem:[#allocation5 + $0x8] sm:$0xff]  ;;  %vm48_vm0 = vcmp.gt.f32.partialorder %v44_v0, 0.0  ;;  %vm49_vm1 = vcmp.gt.f32.partialorder %v45_v1, 0.0  ;;  %s236_s27 = smov [#allocation7]   ;;  %vm117_vm10 = vcmask 0  }
   0xe   :  { %v137_v5 = vsel %vm48_vm0, 1.0, %v235_v4  ;;  %v138_v6 = vsel %vm49_vm1, 1.0, %v235_v4  ;;  %s124_s28 = sshll.u32 %s236_s27, 4  ;;  %s125_s28 = int_to_ptr.vmem [resolvable:$true] %s124_s28 }
   0xf   :  { %v54_v7 = vmul.f32 %v137_v5, %v46_v2  ;;  %v55_v8 = vmul.f32 %v138_v6, %v47_v3 }
  0x11   :  { %v56_v9 = vsub.f32 %v44_v0, %v54_v7  ;;  %v57_v10 = vsub.f32 %v45_v1, %v55_v8 }
  0x13   :  { %v58_v11 = vand.u32 2147483647, %v56_v9  ;;  %v59_v12 = vand.u32 2147483647, %v57_v10 }
  0x15   :  { %v60_v13 = vmax.f32 %v58_v11, %v59_v12  ;;  %v76_v32 = vmul.f32 %v58_v11, %v58_v11  ;;  %v77_v33 = vmul.f32 %v59_v12, %v59_v12 }
  0x17   :  { %61 = vmax.xlane.f32.xlu0 %v60_v13 }
  0x8a   :  { %v62_v14 = vpop.xlane.xlu0 %61 }
  0x8b   :  { %v63_v15 = vrot.slane %v62_v14, 4 }
  0x8d   :  { %v64_v16 = vmax.f32 %v62_v14, %v63_v15 }
  0x8f   :  { %v65_v17 = vrot.slane %v64_v16, 2 }
  0x91   :  { %v66_v18 = vmax.f32 %v64_v16, %v65_v17 }
  0x93   :  { %v67_v19 = vrot.slane %v66_v18, 1 }
  0x95   :  { %v68_v20 = vmax.f32 %v66_v18, %v67_v19 }
  0x97   :  { %139 = vpush %v68_v20 }
  0xc8   :  { %s140_s0 = spop %139 }
  0xc9   :  { %s70_s1 = smul.f32 0.2, %s140_s0 }
  0xcb   :  { %v71_v21 = vstv %s70_s1  ;;  %s78_s21 = smul.f32 %s70_s1, %s70_s1 }
  0xcc   :  { %151 = vrcp.f32 %v71_v21  ;;  %v96_v25 = vand.u32 2147483648, %v71_v21  ;;  %v94_v27 = vand.u32 2147483647, %v71_v21  ;;  %vm90_vm3 = vweird.f32 %v71_v21 }
  0xcd   :  { %v79_v34 = vstv %s78_s21  ;;  %vm72_vm8 = vcmp.lt.f32.partialorder %v58_v11, %v71_v21  ;;  %vm73_vm9 = vcmp.lt.f32.partialorder %v59_v12, %v71_v21 }
  0xce   :  { %v97_v29 = vor.u32 1.1754944e-38, %v96_v25  ;;  %vm95_vm5 = vcmp.eq.f32.partialorder %v94_v27, 8.507059e+37  ;;  %vm80_vm6 = vcmp.gt.f32.partialorder %v76_v32, %v79_v34  ;;  %vm81_vm7 = vcmp.gt.f32.partialorder %v77_v33, %v79_v34 }
  0xcf   :  { %v82_v35 = vsel %vm80_vm6, %v76_v32, 0.0  ;;  %v83_v36 = vsel %vm81_vm7, %v77_v33, 0.0  ;;  %v74_v40 = vsel %vm72_vm8, %v58_v11, 0.0  ;;  %v75_v41 = vsel %vm73_vm9, %v59_v12, 0.0 }
  0xd2   :  { %v152_v22 = vpop.eup %151 }
  0xd3   :  { %v86_v23 = vmul.f32 %v152_v22, %v71_v21  ;;  %vm91_vm2 = vweird.f32 %v152_v22 }
  0xd4   :  { %vm92_vm4 = vmor %vm90_vm3, %vm91_vm2 }
  0xd5   :  { %v87_v24 = vsub.f32 1.0, %v86_v23 }
  0xd7   :  { %v88_v26 = vmul.f32 %v152_v22, %v87_v24 }
  0xd9   :  { %v89_v28 = vadd.f32 %v152_v22, %v88_v26 }
  0xdb   :  { %v93_v30 = vsel %vm92_vm4, %v152_v22, %v89_v28 }
  0xdc   :  { %v98_v31 = vsel %vm95_vm5, %v97_v29, %v93_v30 }
  0xdd   :  { %141 = vpush %v98_v31 }
 0x10e   :  { %s142_s22 = spop %141 }
 0x10f   :  { %s100_s23 = smul.f32 0.5, %s142_s22 }
 0x111   :  { %v101_v37 = vstv %s100_s23 }
 0x112   :  { %v102_v38 = vmul.f32 %v101_v37, %v82_v35  ;;  %v103_v39 = vmul.f32 %v101_v37, %v83_v36 }
 0x114   :  { %v104_v42 = vadd.f32 %v102_v38, %v74_v40  ;;  %v105_v43 = vadd.f32 %v103_v39, %v75_v41 }
 0x116   :  { %v106_v44 = vadd.f32 %v105_v43, %v104_v42 }
 0x118   :  { %107 = vadd.xlane.f32.xlu0 %v106_v44 }
 0x18b   :  { %v108_v45 = vpop.xlane.xlu0 %107 }
 0x18c   :  { %v109_v46 = vrot.slane %v108_v45, 4 }
 0x18e   :  { %v110_v47 = vadd.f32 %v109_v46, %v108_v45 }
 0x190   :  { %v111_v48 = vrot.slane %v110_v47, 2 }
 0x192   :  { %v112_v49 = vadd.f32 %v111_v48, %v110_v47 }
 0x194   :  { %v113_v50 = vrot.slane %v112_v49, 1 }
 0x196   :  { %v114_v51 = vadd.f32 %v113_v50, %v112_v49 }
 0x198   :  { %143 = vpush %v114_v51 }
 0x1c9   :  { %s144_s29 = spop %143 }
 0x1ca   :  { %v116_v52 = vstv %s144_s29 }
 0x1cb   :  { %118 = vst.msk [vmem:[#allocation7] sm:$0x1] %vm117_vm10, %v116_v52 }
 0x1cc   :  { %129 = dma.vmem_to_hbm [thread:$0]  %s125_s28, 16, %s127_s26, [#allocation4]  }
 0x1cd   :  { %229 = dma.done.wait [#allocation4], 16  }
 0x1ce   :  { %230 = vsyncadd [#allocation4], 4294967280 }
 0x1cf   :  { %134 = vsyncpa [#allocation3], 1 }
 0x1d0   :  { %135 = vsyncpa [#allocation6], 1 }
 0x1d1   :  { %136 = vsyncpa [#allocation4], 1 }

</bundles_post_ra>
